<compile_context>
chip_gen: v6e
topology: v6e:2x2x1
jax: 0.10.0
libtpu: 0.0.40
codegen_flags: <defaults>
</compile_context>

<pallas_src>
import math

import jax
import jax.numpy as jnp
from jax.experimental import pallas as pl
from jax.experimental.pallas import tpu as pltpu


def _make_kernel(E: int, tile_rows: int, tile_cols: int, fold: bool):
    """Kernel for one (tile_rows, tile_cols) block of the per-batch 2-D view.

    Standard view: tile_cols == E, a row is one sequence position.
    Folded view (E < 128, E | 128): tile_cols == 128, each row packs 128 // E
    consecutive sequence positions; (pos, e) recovered from the flat index.
    """
    neg_log_over_e = -math.log(10000.0) / float(E)
    log2_e = E.bit_length() - 1  # only used on the fold path (E is a power of 2)

    def kernel(x_ref, o_ref):
        # Row offset of this block -- program_id only at the TOP LEVEL of the body.
        r0 = pl.program_id(1) * tile_rows

        lane = jax.lax.broadcasted_iota(jnp.int32, (1, tile_cols), 1)
        row = jax.lax.broadcasted_iota(jnp.int32, (tile_rows, tile_cols), 0) + r0

        if fold:
            flat = row * tile_cols + lane                 # flat index into (L, E)
            e = lane & (E - 1)                            # embedding column, (1, C)
            pos = (flat >> log2_e).astype(jnp.float32)    # sequence position, (T, C)
        else:
            e = lane                                      # (1, E)
            pos = row.astype(jnp.float32)                 # (T, E)

        two_k = (e - (e & 1)).astype(jnp.float32)         # 2 * (e // 2)
        inv_freq = jnp.exp(two_k * neg_log_over_e)        # (1, C) -- E exps only
        angle = pos * inv_freq                            # (T, C)
        pe = jnp.where((e & 1) == 0, jnp.sin(angle), jnp.cos(angle))

        # Add natively in the input dtype (bf16 VALU on v6e/v7x); single PE cast.
        o_ref[...] = x_ref[...] + pe.astype(o_ref.dtype)

    return kernel


def _sublane_multiple(dtype) -> int:
    # f32 -> 8, bf16 -> 16, int8/fp8 -> 32 (sublane packing).
    return max(8, 32 // jnp.dtype(dtype).itemsize)


def _choose_rows(num_rows, row_bytes, mult, budget_bytes=4 << 20, min_blocks=1):
    """Row-tile: multiple of `mult` (or the full extent), block <= ~4 MiB."""
    if num_rows <= mult:
        return num_rows
    if min_blocks <= 1 and num_rows * row_bytes <= budget_bytes:
        return num_rows  # single full block (legal: equals the full dim)
    max_t = max(mult, ((budget_bytes // max(1, row_bytes)) // mult) * mult)
    cap = max(mult, ((num_rows // max(1, min_blocks)) // mult) * mult)
    max_t = min(max_t, cap, max(mult, (num_rows // mult) * mult))
    t = max_t
    while t >= mult:
        if num_rows % t == 0:      # prefer a divisor (no masked edge block)
            return t
        t -= mult
    return max_t                   # masked edge block (still a multiple of `mult`)


def sinusoid_encoding(x: jax.Array, *, block_rows: int | None = None,
                      donate_x: bool = False) -> jax.Array:
    """Adds sinusoidal positional embeddings to x of shape (N, L, E)."""
    N, L, E = x.shape
    assert E % 2 == 0, "hidden_dim (E) must be even (same assumption as the PyTorch module)"
    dtype = x.dtype
    itemsize = jnp.dtype(dtype).itemsize
    mult = _sublane_multiple(dtype)

    # Lane-dense fold for small embedding dims (E | 128  =>  E is a power of two).
    fold = (E < 128) and (128 % E == 0) and ((L * E) % 128 == 0)
    if fold:
        cols = 128
        rows = (L * E) // 128
        xv = x.reshape(N, rows, cols)
    else:
        cols = E
        rows = L
        xv = x

    # Ensure >= 2 blocks on a parallel axis when N == 1 (v7x has 2 TensorCores).
    min_blocks = 2 if N == 1 else 1
    tr = block_rows if block_rows is not None else _choose_rows(
        rows, cols * itemsize, mult, min_blocks=min_blocks)
    tr = min(tr, rows)

    grid = (N, pl.cdiv(rows, tr))
    kernel = _make_kernel(E, tr, cols, fold)

    out = pl.pallas_call(
        kernel,
        out_shape=jax.ShapeDtypeStruct((N, rows, cols), dtype),
        grid_spec=pltpu.PrefetchScalarGridSpec(
            num_scalar_prefetch=0,
            grid=grid,
            in_specs=[pl.BlockSpec((None, tr, cols), lambda n, r: (n, r, 0))],
            out_specs=pl.BlockSpec((None, tr, cols), lambda n, r: (n, r, 0)),
        ),
        compiler_params=pltpu.CompilerParams(
            dimension_semantics=("parallel", "parallel"),
            vmem_limit_bytes=32 << 20,  # 2*in + 2*out ~ 16 MiB; safe on v5e/v6e/v7x
        ),
        input_output_aliases=({0: 0} if donate_x else {}),
    )(xv)

    return out.reshape(N, L, E) if fold else out


def _reference(x: jax.Array) -> jax.Array:
    """Pure-JAX reference mirroring the PyTorch buffer construction."""
    N, L, E = x.shape
    position = jnp.arange(L, dtype=jnp.float32)[:, None]                 # (L, 1)
    div_term = jnp.exp(jnp.arange(0, E, 2, dtype=jnp.float32)
                       * (-math.log(10000.0) / E))                       # (E/2,)
    pe = jnp.zeros((L, E), jnp.float32)
    pe = pe.at[:, 0::2].set(jnp.sin(position * div_term))
    pe = pe.at[:, 1::2].set(jnp.cos(position * div_term))
    return x + pe[None].astype(x.dtype)


if __name__ == "__main__":
    key = jax.random.PRNGKey(0)

    # Small deterministic example matching the module's (N, L, E) forward.
    # E=32 < 128 exercises the lane-dense fold path.
    N, L, E = 2, 8, 32
    x = jax.random.normal(key, (N, L, E), dtype=jnp.float32)
    out = jax.block_until_ready(sinusoid_encoding(x))
    ref = _reference(x)
    assert out.shape == (N, L, E)
    assert out.dtype == x.dtype
    assert jnp.allclose(out, ref, atol=1e-5, rtol=1e-5)

    # Standard lane-dense path (E multiple of 128), several row blocks and a
    # masked edge block (200 % 64 != 0).
    x2 = jax.random.normal(jax.random.PRNGKey(0), (2, 200, 128), dtype=jnp.float32)
    out2 = jax.block_until_ready(sinusoid_encoding(x2, block_rows=64))
    assert jnp.allclose(out2, _reference(x2), atol=1e-4, rtol=1e-5)

    # Folded path with N == 1 (forces >= 2 row blocks for the second TC on v7x).
    x3 = jax.random.normal(jax.random.PRNGKey(0), (1, 64, 64), dtype=jnp.float32)
    out3 = jax.block_until_ready(sinusoid_encoding(x3))
    assert jnp.allclose(out3, _reference(x3), atol=1e-5, rtol=1e-5)

    # bf16 fast path (native-dtype add, 16-row sublane rounding).
    x4 = jax.random.normal(jax.random.PRNGKey(0), (2, 64, 64), dtype=jnp.bfloat16)
    out4 = jax.block_until_ready(sinusoid_encoding(x4))
    assert jnp.allclose(out4.astype(jnp.float32), _reference(x4).astype(jnp.float32),
                        atol=2e-2, rtol=2e-2)

    print("KERNEL_OK")
</pallas_src>

<mosaic_0001>
module attributes {stable_mosaic.version = 11 : i64} {
  func.func @kernel(%arg0: i32, %arg1: i32, %arg2: memref<1x2x128xf32, #tpu.memory_space<vmem>>, %arg3: memref<1x2x128xf32, #tpu.memory_space<vmem>>) attributes {dimension_semantics = [#tpu.dimension_semantics<parallel>, #tpu.dimension_semantics<parallel>], iteration_bounds = array<i64: 2, 1>, scalar_prefetch = 0 : i64, scratch_operands = 0 : i64, tpu.core_type = #tpu.core_type<tc>, window_params = [{transform_indices = @transform_0, window_bounds = array<i64: 1, 2, 128>}, {transform_indices = @transform_1, window_bounds = array<i64: 1, 2, 128>}]} {
    %c2_i32 = arith.constant 2 : i32
    %0 = arith.muli %arg1, %c2_i32 : i32
    %1 = tpu.iota {dimensions = array<i32: 1>} : vector<1x128xi32>
    %2 = tpu.iota {dimensions = array<i32: 0>} : vector<2x128xi32>
    %3 = vector.broadcast %0 : i32 to vector<2x128xi32>
    %4 = arith.addi %2, %3 : vector<2x128xi32>
    %c128_i32 = arith.constant 128 : i32
    %5 = vector.broadcast %c128_i32 : i32 to vector<2x128xi32>
    %6 = arith.muli %4, %5 : vector<2x128xi32>
    %7 = vector.broadcast %1 : vector<1x128xi32> to vector<2x128xi32>
    %8 = arith.addi %6, %7 : vector<2x128xi32>
    %c31_i32 = arith.constant 31 : i32
    %9 = vector.broadcast %c31_i32 : i32 to vector<1x128xi32>
    %10 = arith.andi %1, %9 : vector<1x128xi32>
    %c5_i32 = arith.constant 5 : i32
    %11 = vector.broadcast %c5_i32 : i32 to vector<2x128xi32>
    %12 = arith.shrsi %8, %11 : vector<2x128xi32>
    %13 = arith.sitofp %12 : vector<2x128xi32> to vector<2x128xf32>
    %c1_i32 = arith.constant 1 : i32
    %14 = vector.broadcast %c1_i32 : i32 to vector<1x128xi32>
    %15 = arith.andi %10, %14 : vector<1x128xi32>
    %16 = arith.subi %10, %15 : vector<1x128xi32>
    %17 = arith.sitofp %16 : vector<1x128xi32> to vector<1x128xf32>
    %cst = arith.constant -0.287823141 : f32
    %18 = vector.broadcast %cst : f32 to vector<1x128xf32>
    %19 = arith.mulf %17, %18 : vector<1x128xf32>
    %20 = math.exp %19 : vector<1x128xf32>
    %21 = vector.broadcast %20 : vector<1x128xf32> to vector<2x128xf32>
    %22 = arith.mulf %13, %21 : vector<2x128xf32>
    %c1_i32_0 = arith.constant 1 : i32
    %23 = vector.broadcast %c1_i32_0 : i32 to vector<1x128xi32>
    %24 = arith.andi %10, %23 : vector<1x128xi32>
    %c0_i32 = arith.constant 0 : i32
    %25 = vector.broadcast %c0_i32 : i32 to vector<1x128xi32>
    %26 = arith.cmpi eq, %24, %25 : vector<1x128xi32>
    %27 = math.sin %22 : vector<2x128xf32>
    %28 = math.cos %22 : vector<2x128xf32>
    %29 = vector.shape_cast %26 : vector<1x128xi1> to vector<1x128xi1>
    %30 = vector.broadcast %29 : vector<1x128xi1> to vector<2x128xi1>
    %31 = arith.select %30, %27, %28 : vector<2x128xi1>, vector<2x128xf32>
    %c0 = arith.constant 0 : index
    %c0_1 = arith.constant 0 : index
    %c0_2 = arith.constant 0 : index
    %32 = vector.load %arg2[%c0, %c0_1, %c0_2] : memref<1x2x128xf32, #tpu.memory_space<vmem>>, vector<1x2x128xf32>
    %33 = vector.shape_cast %32 : vector<1x2x128xf32> to vector<2x128xf32>
    %34 = arith.addf %33, %31 : vector<2x128xf32>
    %c0_3 = arith.constant 0 : index
    %c0_4 = arith.constant 0 : index
    %c0_5 = arith.constant 0 : index
    %35 = vector.load %arg3[%c0_3, %c0_4, %c0_5] : memref<1x2x128xf32, #tpu.memory_space<vmem>>, vector<1x2x128xf32>
    %36 = vector.shape_cast %35 : vector<1x2x128xf32> to vector<2x128xf32>
    %37 = vector.shape_cast %34 : vector<2x128xf32> to vector<1x2x128xf32>
    tpu.vector_store %arg3[%c0_3, %c0_4, %c0_5], %37 {strides = array<i32>} : memref<1x2x128xf32, #tpu.memory_space<vmem>>, vector<1x2x128xf32>,
    return
  }
  func.func @transform_0(%arg0: i32, %arg1: i32) -> (i32, i32, i32) {
    %c0_i32 = arith.constant 0 : i32
    %c0_i32_0 = arith.constant 0 : i32
    return %arg0, %arg1, %c0_i32 : i32, i32, i32
  }
  func.func @transform_1(%arg0: i32, %arg1: i32) -> (i32, i32, i32) {
    %c0_i32 = arith.constant 0 : i32
    %c0_i32_0 = arith.constant 0 : i32
    return %arg0, %arg1, %c0_i32 : i32, i32, i32
  }
}

</mosaic_0001>

<bundles_post_ra>
// kernel: tpu_custom_call.1
= control target key start
LH: loop header
LB: loop body
LE: loop exit
PB: predicated region body
PF: predicated region fallthrough
CT: control target
= control target key end

     0   :  { %6 = vsyncpa [#allocation3], 0  ;;  %s870_s0 = inlined_call_operand.hbm [shape: f32[2,2,128], index: 0, kind: input, shape index: {}]   ;;  %s871_s1 = inlined_call_operand.hbm [shape: f32[2,2,128], index: 1, kind: output, shape index: {}]  }
   0x1   :  { %8 = vsyncpa [#allocation3 + $0x1], 0 }
   0x2   :  { %9 = vsyncpa [#allocation4], 0 }
   0x3   :  { %11 = vsyncpa [#allocation4 + $0x1], 0  ;;  %s704_s6 = smov 0   ;;  %s706_s7 = smov 0  }
   0x4   :  { %s708_s8 = smov 0   ;;  %s710_s9 = smov 0  }
   0x5   :  { %s712_s10 = smov 0   ;;  %s714_s11 = smov 0  }
   0x6 LB: > { %s477_s12 = sadd.s32 4294967295, %s684_s11   ;;  %s478_s13 = sadd.s32 4294967294, %s684_s11   ;;  %s684_s11 = sphi %s714_s11, %s17_s11   ;;  %s680_s10 = sphi %s712_s10, %s883_s10   ;;  %s676_s9 = sphi %s710_s9, %s882_s9   ;;  %s672_s8 = sphi %s708_s8, %s881_s8   ;;  %s668_s7 = sphi %s706_s7, %s880_s7   ;;  %s664_s6 = sphi %s704_s6, %s879_s6  }
   0x7   : > { %s29_s14 = sadd.s32 1, %s680_s10  ;;  %s38_s15 = sadd.s32 1, %s672_s8 }
   0x8   : > { %p31_p0 = scmp.ge.s32.totalorder %s29_s14, 2  ;;  %p45_p1 = scmp.ne.s32.totalorder %s672_s8, %s668_s7 }
   0x9   : > { %p46_p2 = scmp.eq.s32.totalorder %s684_s11, 0  ;;  %p51_p3 = scmp.ne.s32.totalorder %s668_s7, %s664_s6 }
   0xa   : > { %s885_s14 = smov (%p31_p0, %s29_s14), 0  ;;  %p52_p5 = scmp.eq.s32.totalorder %s477_s12, 0 }
   0xb   : > { %p745_p4 = por %p46_p2, %p45_p1  ;;  %s33_s17 = ssub.s32 %s680_s10, %s885_s14 }
   0xc   : > { %p77_p6 = scmp.eq.s32.totalorder %s477_s12, 1  ;;  %p36_p7 = scmp.eq.s32.totalorder %s33_s17, 0 }
   0xd   : > { %p751_p8 = por %p52_p5, %p51_p3  ;;  %p83_p10 = scmp.eq.s32.totalorder %s478_s13, 1 }
   0xe   : > { %p755_p9 = por %p77_p6, %p45_p1  ;;  %p514_p13 = scmp.lt.s32.totalorder %s684_s11, 2 }
   0xf   : > { %s760_s20 = scalar_select %p36_p7, %s672_s8, %s38_s15  }
  0x10   : > { %p762_p11 = por %p83_p10, %p51_p3  ;;  %s103_s22 = sand.u32 1, %s672_s8  }
  0x11   : > { %s481_s23 = sshll.u32 %s103_s22, 1  ;;  %s482_s24 = sshll.u32 %s680_s10, 5 }
  0x12   : > { %s875_s21 = scalar_select %p762_p11, 1, 0 }
  0x13   : > { %s113_s27 = scalar_lea.hbm %s870_s0, %s482_s24  ;;  %s107_s28 = scalar_lea.vmem [#allocation2], %s481_s23 }
  0x14   : > { %s115_s29 = sshll.u32 %s107_s28, 4  ;;  %p775_p0 = pnand %p514_p13, %p745_p4  ;;  %s116_s29 = int_to_ptr.vmem [resolvable:$true] %s115_s29 }
  0x15   : > { %p483_p1 = scmp.ge.s32.totalorder %s684_s11, 1  ;;  %p120_p2 = scmp.lt.s32.totalorder %s684_s11, 3 }
  0x16   : > { %s104_s2 = scalar_lea.sflag [#allocation3], %s103_s22  ;;  %p578_p3 = pneg %p775_p0 }
  0x17   : > { %s589_s3 = scalar_lea.vmem %s116_s29, 32  ;;  %s686_s4 = smov [#allocation2]  }
  0x18   : > { %p590_p5 = scmp.ne.s32.totalorder %s116_s29, %s589_s3  ;;  %s594_s5 = sshll.u32 %s686_s4, 4  ;;  %s595_s5 = int_to_ptr.vmem [resolvable:$false] %s594_s5 }
  0x19   : > { %s596_s12 = scalar_lea.vmem %s595_s5, 64  ;;  %p597_p10 = scmp.lt.s32.totalorder %s116_s29, %s595_s5 }
  0x1a   : > { %p592_p6 = pnand %p590_p5, %p578_p3  ;;  %p598_p12 = scmp.lt.s32.totalorder %s596_s12, %s589_s3 }
  0x1c   : > { %p593_p7 = pneg %p592_p6  ;;  %p599_p4 = por %p598_p12, %p597_p10 }
  0x1e   : > { %p600_p13 = pnand %p599_p4, %p593_p7 }
  0x20   : > { %603 = shalt.err (!%p600_p13)
}
  0x21   : > { %509 = dma.hbm_to_vmem [thread:$0]  (!%p775_p0), %s113_s27, 32, %s116_s29, %s104_s2  }
  0x22   : > { %p121_p11 = pnand %p483_p1, %p120_p2 }
  0x23   : > { %s790_s13 = sand.u32 (!%p121_p11), 1, %s668_s7  }
  0x24   : > { %124 = sbr.rel (%p121_p11) target bundleno = 173 (0xad), region = 24  ;;  %s484_s15 = sshll.u32 (!%p121_p11), %s790_s13, 1 }
  0x25   : > { %s127_s16 = scalar_lea.sflag (!%p121_p11), [#allocation3], %s790_s13  ;;  %s796_s17 = scalar_lea.vmem (!%p121_p11), [#allocation2], %s484_s15 }
  0x29   : > { %655 = dma.done.wait (%p751_p8), %s127_s16, 32  }
  0x2a   : > { %657 = vsyncadd (%p751_p8), %s127_s16, 4294967264  ;;  %v150_v0 = vlaneseq  ;;  %v687_v26 = vmov 683565275   ;;  %v688_v28 = vmov 2475754826   ;;  %s148_s18 = scalar_lea.vmem [#allocation5], %s484_s15 }
  0x2b   : > { %v689_v30 = vmov 2131351028   ;;  %v690_v32 = vmov 2102212464   ;;  %v691_v34 = vmov 920167782  }
  0x2c   : > { %v151_v1 = vand.u32 127, %v150_v0  ;;  %v153_v5 = vshrl.u32 %v150_v0, 7  ;;  %v692_v41 = vmov 1326507024   ;;  %s397_s22 = sshll.u32 %s148_s18, 4  ;;  %s495_s23 = sshll.u32 %s676_s9, 5  ;;  %s398_s22 = int_to_ptr.vmem [resolvable:$true] %s397_s22 }
  0x2d   : > { %s395_s26 = scalar_lea.hbm %s871_s1, %s495_s23  ;;  %s383_s27 = scalar_lea.sflag [#allocation4], %s790_s13 }
  0x2e   : > { %v158_v2 = vand.u32 31, %v151_v1  ;;  %v156_v8 = vmul.u32 128, %v153_v5  ;;  %s604_s28 = scalar_lea.vmem %s398_s22, 32  ;;  %s693_s29 = smov [#allocation5]  }
  0x2f   : > { %p605_p8 = scmp.ne.s32.totalorder %s398_s22, %s604_s28  ;;  %s608_s30 = sshll.u32 %s693_s29, 4  ;;  %s609_s30 = int_to_ptr.vmem [resolvable:$false] %s608_s30 }
  0x30   : > { %v802_v3 = vand.u32 1, %v158_v2  ;;  %v157_v10 = vadd.s32 %v156_v8, %v151_v1  ;;  %s610_s9 = scalar_lea.vmem %s609_s30, 64  ;;  %p611_p0 = scmp.lt.s32.totalorder %s398_s22, %s609_s30 }
  0x31   : > { %p606_p11 = pnand %p605_p8, %p755_p9  ;;  %p612_p1 = scmp.lt.s32.totalorder %s610_s9, %s604_s28 }
  0x32   : > { %v162_v4 = vsub.s32 %v158_v2, %v802_v3  ;;  %v159_v11 = vshra.s32 %v157_v10, 5 }
  0x33   : > { %p607_p12 = pneg %p606_p11  ;;  %p613_p2 = por %p612_p1, %p611_p0 }
  0x34   : > { %v163_v6 = vcvt.s32.f32 %v162_v4  ;;  %v160_v12 = vcvt.s32.f32 %v159_v11 }
  0x35   : > { %p614_p3 = pnand %p613_p2, %p607_p12 }
  0x36   : > { %v164_v7 = vmul.f32 -0.28782314, %v163_v6 }
  0x38   : > { %v165_v9 = vmul.f32 1.442695, %v164_v7 }
  0x3a   : > { %570 = vpow2.f32 %v165_v9 }
  0x47   : > { %v571_v13 = vpop.eup %570 }
  0x48   : > { %v805_v14 = vmul.f32 %v571_v13, %v160_v12 }
  0x4a   : > { %v172_v15 = vand.u32 2139095040, %v805_v14  ;;  %v169_v17 = vand.u32 2147483647, %v805_v14  ;;  %vm171_vm7 = vcmp.lt.s32.totalorder %v805_v14, 0  ;;  %vm261_vm15 = vweird.f32 %v805_v14 }
  0x4c   : > { %v173_v16 = vshrl.u32 %v172_v15, 23  ;;  %v176_v20 = vand.u32 8388607, %v169_v17  ;;  %vm170_vm8 = vcmp.le.f32.partialorder %v169_v17, 0.7853982 }
  0x4e   : > { %v486_v18 = vadd.s32 4294967169, %v173_v16  ;;  %v177_v23 = vor.u32 8388608, %v176_v20 }
  0x50   : > { %v179_v19 = vadd.s32 1, %v486_v18  ;;  %v217_v43 = vshll.u32 %v177_v23, 8 }
  0x52   : > { %vm180_vm0 = vcmp.gt.s32.totalorder %v179_v19, 0 }
  0x53   : > { %v181_v21 = vsel %vm180_vm0, %v179_v19, 0  ;;  %vm168_vm0 = vcmp.eq.s32.totalorder %v802_v3, 0 }
  0x54   : > { %v183_v22 = vand.u32 31, %v181_v21  ;;  %v182_v24 = vshrl.u32 %v181_v21, 5 }
  0x56   : > { %v184_v25 = vsub.s32 32, %v183_v22  ;;  %v186_v27 = vshll.u32 %v687_v26, %v183_v22  ;;  %v189_v29 = vshll.u32 %v688_v28, %v183_v22  ;;  %v192_v31 = vshll.u32 %v689_v30, %v183_v22 }
  0x57   : > { %v195_v33 = vshll.u32 %v690_v32, %v183_v22  ;;  %v198_v35 = vshll.u32 %v691_v34, %v183_v22  ;;  %vm201_vm1 = vcmp.lt.s32.totalorder %v182_v24, 1  ;;  %vm204_vm2 = vcmp.lt.s32.totalorder %v182_v24, 4 }
  0x58   : > { %v185_v36 = vshrl.u32 %v687_v26, %v184_v25  ;;  %v187_v37 = vshrl.u32 %v688_v28, %v184_v25  ;;  %v190_v38 = vshrl.u32 %v689_v30, %v184_v25  ;;  %v193_v39 = vshrl.u32 %v690_v32, %v184_v25 }
  0x59   : > { %v196_v40 = vshrl.u32 %v691_v34, %v184_v25  ;;  %v199_v42 = vshrl.u32 %v692_v41, %v184_v25  ;;  %vm202_vm3 = vcmp.lt.s32.totalorder %v182_v24, 2  ;;  %vm203_vm4 = vcmp.lt.s32.totalorder %v182_v24, 3 }
  0x5a   : > { %v188_v44 = vor.u32 %v187_v37, %v186_v27  ;;  %v191_v45 = vor.u32 %v190_v38, %v189_v29  ;;  %v194_v46 = vor.u32 %v193_v39, %v192_v31 }
  0x5b   : > { %v197_v47 = vor.u32 %v196_v40, %v195_v33  ;;  %v200_v48 = vor.u32 %v199_v42, %v198_v35 }
  0x5c   : > { %v205_v49 = vsel %vm201_vm1, %v185_v36, %v188_v44  ;;  %v206_v50 = vsel %vm204_vm2, %v194_v46, 2102212464  ;;  %v209_v51 = vsel %vm201_vm1, %v188_v44, %v191_v45  ;;  %v213_v52 = vsel %vm201_vm1, %v191_v45, %v194_v46 }
  0x5d   : > { %v207_v53 = vsel %vm203_vm4, %v191_v45, %v206_v50  ;;  %v210_v54 = vsel %vm204_vm2, %v197_v47, 920167782  ;;  %v214_v55 = vsel %vm204_vm2, %v200_v48, 1326507024 }
  0x5e   : > { %v211_v56 = vsel %vm203_vm4, %v194_v46, %v210_v54  ;;  %v215_v57 = vsel %vm203_vm4, %v197_v47, %v214_v55  ;;  %v208_v58 = vsel %vm202_vm3, %v205_v49, %v207_v53  ;;  %v379_v47 = vld [vmem:[%s796_s17] sm:$0x3] }
  0x5f   : > { %v212_v59 = vsel %vm202_vm3, %v209_v51, %v211_v56  ;;  %v216_v60 = vsel %vm202_vm3, %v213_v52, %v215_v57  ;;  %v224_v1 = vmul.u32 %v217_v43, %v208_v58 }
  0x60   : > { %v811_v61 = vmul.u32.u64.low %v217_v43, %v216_v60  ;;  %v812_v62 = vmul.u32.u64.high %v217_v43, %v216_v60, %v811_v61  ;;  %v814_v63 = vmul.u32.u64.low %v217_v43, %v212_v59  ;;  %v815_v0 = vmul.u32.u64.high %v217_v43, %v212_v59, %v814_v63 }
  0x62   : > { %vm226_vm5 = vc.u32 %v812_v62, %v814_v63  ;;  %v227_v2 = vadd.s32 1, %v815_v0  ;;  %v225_v15 = vadd.s32 %v814_v63, %v812_v62 }
  0x64   : > { %v228_v4 = vsel %vm226_vm5, %v227_v2, %v815_v0 }
  0x65   : > { %v229_v5 = vadd.s32 %v228_v4, %v224_v1 }
  0x67   : > { %v230_v6 = vadd.s32 536870912, %v229_v5 }
  0x69   : > { %v231_v7 = vshrl.u32 %v230_v6, 30 }
  0x6b   : > { %v232_v8 = vshll.u32 %v231_v7, 30  ;;  %v255_v29 = vsub.s32 4, %v231_v7 }
  0x6d   : > { %v233_v9 = vsub.s32 %v229_v5, %v232_v8  ;;  %v256_v32 = vsel %vm171_vm7, %v255_v29, %v231_v7 }
  0x6e   : > { %v258_v34 = vsel %vm170_vm8, 0, %v256_v32 }
  0x6f   : > { %v235_v10 = vsub.s32 0, %v233_v9  ;;  %v262_v35 = vadd.s32 3, %v258_v34  ;;  %v366_v37 = vand.u32 3, %v258_v34 }
  0x71   : > { %v487_v11 = vmin.u32 %v235_v10, %v233_v9  ;;  %v263_v36 = vand.u32 3, %v262_v35  ;;  %vm371_vm10 = vcmp.eq.s32.totalorder %v366_v37, 2  ;;  %vm368_vm12 = vcmp.eq.s32.totalorder %v366_v37, 0 }
  0x72   : > { %vm367_vm14 = vcmp.lt.s32.totalorder %v366_v37, 2 }
  0x73   : > { %v237_v12 = vclz %v487_v11  ;;  %vm268_vm9 = vcmp.eq.s32.totalorder %v263_v36, 2  ;;  %vm265_vm11 = vcmp.eq.s32.totalorder %v263_v36, 0  ;;  %vm264_vm13 = vcmp.lt.s32.totalorder %v263_v36, 2 }
  0x75   : > { %v488_v13 = vadd.s32 4294967294, %v237_v12 }
  0x77   : > { %vm489_vm6 = vcmp.lt.s32.totalorder %v488_v13, 0 }
  0x78   : > { %v240_v16 = vsel %vm489_vm6, 0, %v488_v13 }
  0x79   : > { %v241_v18 = vsub.s32 32, %v240_v16  ;;  %v242_v19 = vshll.u32 %v233_v9, %v240_v16  ;;  %v245_v20 = vsub.s32 4294967266, %v240_v16 }
  0x7b   : > { %v243_v21 = vshrl.u32 %v225_v15, %v241_v18  ;;  %v246_v22 = vadd.s32 127, %v245_v20 }
  0x7d   : > { %v244_v23 = vor.u32 %v243_v21, %v242_v19  ;;  %v247_v24 = vshll.u32 %v246_v22, 23 }
  0x7f   : > { %v248_v25 = vor.u32 4788187, %v247_v24  ;;  %v251_v26 = vcvt.s32.f32 %v244_v23 }
  0x81   : > { %v249_v27 = vand.u32 2147483647, %v248_v25 }
  0x83   : > { %v252_v28 = vmul.f32 %v251_v26, %v249_v27 }
  0x85   : > { %v253_v30 = vxor.u32 2147483648, %v252_v28 }
  0x87   : > { %v254_v31 = vsel %vm171_vm7, %v253_v30, %v252_v28 }
  0x88   : > { %v257_v33 = vsel %vm170_vm8, %v805_v14, %v254_v31 }
  0x89   : > { %572 = vcosq.f32 %v257_v33 }
  0x8a   : > { %574 = vsinq.f32 %v257_v33 }
  0x96   : > { %v573_v38 = vpop.eup %572 }
  0x97   : > { %v575_v39 = vpop.eup %574  ;;  %v269_v40 = vxor.u32 2147483648, %v573_v38 }
  0x98   : > { %v266_v17 = vxor.u32 2147483648, %v575_v39 }
  0x99   : > { %v270_v41 = vsel %vm268_vm9, %v269_v40, %v575_v39  ;;  %v373_v42 = vsel %vm371_vm10, %v269_v40, %v575_v39 }
  0x9a   : > { %v267_v43 = vsel %vm265_vm11, %v573_v38, %v266_v17  ;;  %v370_v44 = vsel %vm368_vm12, %v573_v38, %v266_v17 }
  0x9b   : > { %v271_v45 = vsel %vm264_vm13, %v267_v43, %v270_v41  ;;  %v374_v46 = vsel %vm367_vm14, %v370_v44, %v373_v42 }
  0x9c   : > { %v272_v48 = vsel %vm261_vm15, nan, %v271_v45  ;;  %v375_v49 = vsel %vm261_vm15, nan, %v374_v46 }
  0x9d   : > { %v378_v50 = vsel %vm168_vm0, %v272_v48, %v375_v49 }
  0x9e   : > { %v380_v51 = vadd.f32 %v379_v47, %v378_v50 }
  0xa0   : > { %381 = vst [vmem:[%s148_s18] sm:$0x3] %v380_v51 }
  0xa1   : > { %617 = shalt.err (!%p614_p3)
}
  0xa2   : > { %s618_s2 = scalar_lea.hbm %s395_s26, 32  ;;  %s622_s5 = scalar_lea.hbm %s871_s1, 64 }
  0xa3   : > { %p619_p5 = scmp.ne.s32.totalorder %s395_s26, %s618_s2  ;;  %p623_p10 = scmp.lt.s32.totalorder %s395_s26, %s871_s1 }
  0xa4   : > { %p624_p4 = scmp.lt.s32.totalorder %s622_s5, %s618_s2 }
  0xa5   : > { %p620_p6 = pnand %p619_p5, %p755_p9 }
  0xa6   : > { %p625_p13 = por %p624_p4, %p623_p10 }
  0xa7   : > { %p621_p7 = pneg %p620_p6 }
  0xa9   : > { %p626_p8 = pnand %p625_p13, %p621_p7 }
  0xab   : > { %629 = shalt.err (!%p626_p8)
}
  0xac   : > { %504 = dma.vmem_to_hbm [thread:$0]  (%p755_p9), %s398_s22, 32, %s395_s26, %s383_s27  }
  0xad PF: > { %s409_s15 = sand.u32 1, %s664_s6   ;;  %p877_p11 = scmp.ne.s32.totalorder %s875_s21, 0 }
  0xae   : > { %p878_p12 = scmp.ge.s32.totalorder %s684_s11, 2  ;;  %s410_s16 = scalar_lea.sflag [#allocation4], %s409_s15 }
  0xb0   : > { %p511_p0 = pnand %p878_p12, %p877_p11 }
  0xb2   : > { %p512_p1 = pneg %p511_p0 }
  0xb4   : > { %659 = dma.done.wait (%p512_p1), %s410_s16, 32  }
  0xb5   : > { %661 = vsyncadd (%p512_p1), %s410_s16, 4294967264  ;;  %s17_s11 = sadd.s32 1, %s684_s11   ;;  %s879_s6 = smov %s668_s7 }
  0xb6   : > { %p14_p2 = scmp.ge.s32.totalorder %s17_s11, 4   ;;  %s880_s7 = smov %s672_s8 }
  0xb7   : > { %s881_s8 = smov %s760_s20  ;;  %s882_s9 = smov %s680_s10 }
  0xb8   : > { %s883_s10 = smov %s885_s14  ;;  %16 = sbr.rel (!%p14_p2) target bundleno = 6 (0x6), region = 69 }
  0xbd   :  { %415 = vsyncpa [#allocation3], 1 }
  0xbe   :  { %417 = vsyncpa [#allocation3 + $0x1], 1 }
  0xbf   :  { %418 = vsyncpa [#allocation4], 1 }
  0xc0   :  { %420 = vsyncpa [#allocation4 + $0x1], 1 }

</bundles_post_ra>
